<compile_context>
chip_gen: v7x
topology: tpu7x:2x2x1
jax: 0.10.0
libtpu: 0.0.40
codegen_flags: <defaults>
</compile_context>

<pallas_src>
import jax
import jax.numpy as jnp
from jax.experimental import pallas as pl
from jax.experimental.pallas import tpu as pltpu

_TILE_BYTES = 8 * 1024 * 1024     # ~8 MiB of x streamed per grid step
_VMEM_LIMIT = 48 * 1024 * 1024    # safe on v7x (64 MiB/TC), ample on v5e/v6e


def _round_up(n, m):
    return ((n + m - 1) // m) * m


def _stable_sigmoid(z):
    # Exact, overflow-safe sigmoid: exp argument is always <= 0.
    ez = jnp.exp(-jnp.abs(z))
    return jnp.where(z >= 0, 1.0 / (1.0 + ez), ez / (1.0 + ez))


# ----------------------------------------------------------------------------
# Small-D path: features on sublanes, batch on lanes (lane-dense everything).
# ----------------------------------------------------------------------------
def _logreg_lanes_kernel(xt_ref, w_ref, b_ref, o_ref):
    # xt_ref: (D, TL)  batch tile on lanes
    # w_ref : (D, 1)   resident across grid steps
    # b_ref : (1, 1)   resident
    # o_ref : (1, TL)  lane-dense output row
    xt = xt_ref[...].astype(jnp.float32)
    w = w_ref[...].astype(jnp.float32)            # broadcasts along lanes
    z = jnp.sum(xt * w, axis=0, keepdims=True) + b_ref[...]
    o_ref[...] = _stable_sigmoid(z).astype(o_ref.dtype)


def _logreg_small_d(x, weight, b2d, B, D, itemsize):
    bytes_per_lane = max(D * itemsize, 1)
    tl = _TILE_BYTES // bytes_per_lane
    tl = max(128, (tl // 128) * 128)
    TL = min(tl, _round_up(B, 128))

    Bp = _round_up(B, TL)
    xt = x.T                                      # (D, B); cheap for small D
    if Bp != B:
        xt = jnp.pad(xt, ((0, 0), (0, Bp - B)))
    wt = weight.reshape(D, 1)

    out = pl.pallas_call(
        _logreg_lanes_kernel,
        out_shape=jax.ShapeDtypeStruct((1, Bp), jnp.float32),
        grid=(Bp // TL,),
        in_specs=[
            pl.BlockSpec((D, TL), lambda i: (0, i)),   # x^T tile (double-buffered)
            pl.BlockSpec((D, 1), lambda i: (0, 0)),    # weight: resident
            pl.BlockSpec((1, 1), lambda i: (0, 0)),    # bias: resident
        ],
        out_specs=pl.BlockSpec((1, TL), lambda i: (0, i)),
        compiler_params=pltpu.CompilerParams(
            dimension_semantics=("parallel",),
            vmem_limit_bytes=_VMEM_LIMIT,
        ),
    )(xt, wt, b2d)

    return out[0, :B].reshape(B, 1)


# ----------------------------------------------------------------------------
# Wide-D path: row-tiled batch, feature axis tiled with an f32 accumulator.
# (Output column is (TB, 1); for D > 256 output bytes are negligible vs x.)
# ----------------------------------------------------------------------------
def _logreg_rows_kernel(x_ref, w_ref, b_ref, o_ref, acc_ref):
    # x_ref: (TB, TD), w_ref: (1, TD), b_ref: (1, 1), o_ref: (TB, 1)
    k = pl.program_id(1)

    @pl.when(k == 0)
    def _():
        acc_ref[...] = jnp.zeros_like(acc_ref)

    x = x_ref[...].astype(jnp.float32)
    w = w_ref[...].astype(jnp.float32)            # broadcasts over rows
    acc_ref[...] += jnp.sum(x * w, axis=-1, keepdims=True)

    @pl.when(k == pl.num_programs(1) - 1)
    def _():
        z = acc_ref[...] + b_ref[...]
        o_ref[...] = _stable_sigmoid(z).astype(o_ref.dtype)


def _logreg_wide_d(x, weight, b2d, B, D, itemsize):
    # Feature tile: keep an (8, TD) row-slab under the tile budget for huge D.
    max_lanes = max(128, (_TILE_BYTES // (8 * itemsize)) // 128 * 128)
    if D <= max_lanes:
        TD, Dp = D, D
    else:
        TD = max_lanes
        Dp = _round_up(D, TD)

    TB = _TILE_BYTES // (TD * itemsize)
    TB = max(8, (TB // 8) * 8)
    TB = min(TB, _round_up(B, 8))

    Bp = _round_up(B, TB)
    if Bp != B or Dp != D:
        x = jnp.pad(x, ((0, Bp - B), (0, Dp - D)))
        weight = jnp.pad(weight, ((0, 0), (0, Dp - D)))

    out = pl.pallas_call(
        _logreg_rows_kernel,
        out_shape=jax.ShapeDtypeStruct((Bp, 1), jnp.float32),
        grid=(Bp // TB, Dp // TD),
        in_specs=[
            pl.BlockSpec((TB, TD), lambda i, k: (i, k)),   # x tile
            pl.BlockSpec((1, TD), lambda i, k: (0, k)),    # weight slice
            pl.BlockSpec((1, 1), lambda i, k: (0, 0)),     # bias: resident
        ],
        out_specs=pl.BlockSpec((TB, 1), lambda i, k: (i, 0)),
        scratch_shapes=[pltpu.VMEM((TB, 1), jnp.float32)],
        compiler_params=pltpu.CompilerParams(
            dimension_semantics=("parallel", "arbitrary"),
            vmem_limit_bytes=_VMEM_LIMIT,
        ),
    )(x, weight, b2d)

    return out[:B]


def logistic_regression(x, weight, bias):
    """x: (B, D), weight: (1, D), bias: (1,) -> (B, 1) f32 = sigmoid(x @ W^T + b)."""
    B, D = x.shape
    itemsize = jnp.dtype(x.dtype).itemsize
    b2d = bias.reshape(1, 1).astype(jnp.float32)

    if D <= 256:
        return _logreg_small_d(x, weight, b2d, B, D, itemsize)
    return _logreg_wide_d(x, weight, b2d, B, D, itemsize)


if __name__ == "__main__":
    key = jax.random.PRNGKey(0)
    k_x, k_w, k_b = jax.random.split(key, 3)

    batch, input_size = 8, 32

    # Deterministic parameter init mimicking nn.Linear's U(-1/sqrt(D), 1/sqrt(D)).
    bound = 1.0 / jnp.sqrt(jnp.float32(input_size))
    weight = jax.random.uniform(k_w, (1, input_size), jnp.float32, -bound, bound)
    bias = jax.random.uniform(k_b, (1,), jnp.float32, -bound, bound)

    x = jax.random.normal(k_x, (batch, input_size), jnp.float32)

    y = logistic_regression(x, weight, bias)
    jax.block_until_ready(y)

    # Reference check (plain JAX).
    y_ref = jax.nn.sigmoid(x @ weight.T + bias)
    assert y.shape == (batch, 1)
    assert jnp.allclose(y, y_ref, atol=1e-4), "mismatch vs reference"

    print("KERNEL_OK")
</pallas_src>

<mosaic_0001>
module attributes {stable_mosaic.version = 11 : i64} {
  func.func @_logreg_lanes_kernel(%arg0: i32, %arg1: memref<32x128xf32, #tpu.memory_space<vmem>>, %arg2: memref<32x1xf32, #tpu.memory_space<vmem>>, %arg3: memref<1x1xf32, #tpu.memory_space<vmem>>, %arg4: memref<1x128xf32, #tpu.memory_space<vmem>>) attributes {dimension_semantics = [#tpu.dimension_semantics<parallel>], iteration_bounds = array<i64: 1>, scalar_prefetch = 0 : i64, scratch_operands = 0 : i64, tpu.core_type = #tpu.core_type<tc>, window_params = [{transform_indices = @transform_0, window_bounds = array<i64: 32, 128>}, {pipeline_mode = #tpu.pipeline_mode<synchronous>, transform_indices = @transform_1, window_bounds = array<i64: 32, 1>}, {pipeline_mode = #tpu.pipeline_mode<synchronous>, transform_indices = @transform_2, window_bounds = array<i64: 1, 1>}, {transform_indices = @transform_3, window_bounds = array<i64: 1, 128>}]} {
    %c0 = arith.constant 0 : index
    %c0_0 = arith.constant 0 : index
    %0 = vector.load %arg1[%c0, %c0_0] : memref<32x128xf32, #tpu.memory_space<vmem>>, vector<32x128xf32>
    %c0_1 = arith.constant 0 : index
    %c0_2 = arith.constant 0 : index
    %1 = vector.load %arg2[%c0_1, %c0_2] : memref<32x1xf32, #tpu.memory_space<vmem>>, vector<32x1xf32>
    %2 = vector.broadcast %1 : vector<32x1xf32> to vector<32x128xf32>
    %3 = arith.mulf %0, %2 : vector<32x128xf32>
    %cst = arith.constant dense<0.000000e+00> : vector<128xf32>
    %4 = vector.multi_reduction <add>, %3, %cst [0] : vector<32x128xf32> to vector<128xf32>
    %5 = vector.shape_cast %4 : vector<128xf32> to vector<1x128xf32>
    %c0_3 = arith.constant 0 : index
    %c0_4 = arith.constant 0 : index
    %6 = vector.load %arg3[%c0_3, %c0_4] : memref<1x1xf32, #tpu.memory_space<vmem>>, vector<1x1xf32>
    %7 = vector.broadcast %6 : vector<1x1xf32> to vector<1x128xf32>
    %8 = arith.addf %5, %7 : vector<1x128xf32>
    %9 = math.absf %8 : vector<1x128xf32>
    %cst_5 = arith.constant 0.000000e+00 : f32
    %10 = vector.broadcast %cst_5 : f32 to vector<1x128xf32>
    %11 = arith.subf %10, %9 : vector<1x128xf32>
    %12 = math.exp %11 : vector<1x128xf32>
    %cst_6 = arith.constant 0.000000e+00 : f32
    %13 = vector.broadcast %cst_6 : f32 to vector<1x128xf32>
    %14 = arith.cmpf oge, %8, %13 : vector<1x128xf32>
    %cst_7 = arith.constant 1.000000e+00 : f32
    %15 = vector.broadcast %cst_7 : f32 to vector<1x128xf32>
    %16 = arith.addf %15, %12 : vector<1x128xf32>
    %cst_8 = arith.constant 1.000000e+00 : f32
    %17 = vector.broadcast %cst_8 : f32 to vector<1x128xf32>
    %18 = arith.divf %17, %16 : vector<1x128xf32>
    %cst_9 = arith.constant 1.000000e+00 : f32
    %19 = vector.broadcast %cst_9 : f32 to vector<1x128xf32>
    %20 = arith.addf %19, %12 : vector<1x128xf32>
    %21 = arith.divf %12, %20 : vector<1x128xf32>
    %22 = arith.select %14, %18, %21 : vector<1x128xi1>, vector<1x128xf32>
    %c0_10 = arith.constant 0 : index
    %c0_11 = arith.constant 0 : index
    %23 = vector.load %arg4[%c0_10, %c0_11] : memref<1x128xf32, #tpu.memory_space<vmem>>, vector<1x128xf32>
    tpu.vector_store %arg4[%c0_10, %c0_11], %22 {strides = array<i32>} : memref<1x128xf32, #tpu.memory_space<vmem>>, vector<1x128xf32>,
    return
  }
  func.func @transform_0(%arg0: i32) -> (i32, i32) {
    %c0_i32 = arith.constant 0 : i32
    %c0_i32_0 = arith.constant 0 : i32
    return %c0_i32, %arg0 : i32, i32
  }
  func.func @transform_1(%arg0: i32) -> (i32, i32) {
    %c0_i32 = arith.constant 0 : i32
    %c0_i32_0 = arith.constant 0 : i32
    %c0_i32_1 = arith.constant 0 : i32
    return %c0_i32, %c0_i32_0 : i32, i32
  }
  func.func @transform_2(%arg0: i32) -> (i32, i32) {
    %c0_i32 = arith.constant 0 : i32
    %c0_i32_0 = arith.constant 0 : i32
    %c0_i32_1 = arith.constant 0 : i32
    return %c0_i32, %c0_i32_0 : i32, i32
  }
  func.func @transform_3(%arg0: i32) -> (i32, i32) {
    %c0_i32 = arith.constant 0 : i32
    %c0_i32_0 = arith.constant 0 : i32
    return %c0_i32, %arg0 : i32, i32
  }
}

</mosaic_0001>

<bundles_post_ra>
// kernel: tpu_custom_call.1
= control target key start
LH: loop header
LB: loop body
LE: loop exit
PB: predicated region body
PF: predicated region fallthrough
CT: control target
= control target key end

     0   :  { %s187_s0 = inlined_call_operand.vmem [shape: f32[32,128], index: 0, kind: input, shape index: {}]   ;;  %s188_s1 = inlined_call_operand.vmem [shape: f32[32,1], index: 1, kind: input, shape index: {}]   ;;  %s189_s2 = inlined_call_operand.<no memory space> [shape: f32[1,1], index: 2, kind: input, shape index: {}]   ;;  %s190_s3 = inlined_call_operand.hbm [shape: f32[1,128], index: 3, kind: output, shape index: {}]  }
   0x1   :  { %v8_v0 = vstv %s189_s2 }
   0x2   :  { %9 = vst [vmem:[#allocation2] sm:$0x1] %v8_v0 }
   0x3   :  { %v23_v1 = vld [vmem:[%s188_s1 + $0x10] sm:$0xff]  ;;  %v21_v2 = vld [vmem:[%s188_s1] sm:$0xff]  ;;  %v126_v3 = vmov 0  }
   0x4   :  { %97 = vset.pattern.permute.xlu1 %v126_v3  ;;  %96 = vset.pattern.permute.xlu0 %v126_v3 }
   0x5   :  { %37 = vperm.xlu1 %97, %v23_v1   ;;  %27 = vperm.xlu0 %96, %v21_v2  }
   0x6   :  { %10 = vsyncpa [#allocation4], 0  ;;  %v24_v4 = vld [vmem:[%s188_s1 + $0x18] sm:$0xff]  ;;  %v22_v5 = vld [vmem:[%s188_s1 + $0x8] sm:$0xff]  ;;  %v64_v22 = vlaneseq }
   0x7   :  { %v17_v9 = vld [vmem:[%s187_s0] sm:$0xff]  ;;  %v18_v10 = vld [vmem:[%s187_s0 + $0x8] sm:$0xff]  ;;  %v19_v11 = vld [vmem:[%s187_s0 + $0x10] sm:$0xff] }
   0x8   :  { %v20_v16 = vld [vmem:[%s187_s0 + $0x18] sm:$0xff]  ;;  %v65_v24 = vshrl.u32 %v64_v22, 7  ;;  %s127_s0 = smov [#allocation3]  }
   0x9   :  { %42 = vperm.xlu1 %97, %v24_v4   ;;  %32 = vperm.xlu0 %96, %v22_v5   ;;  %v58_v6 = vld [vmem:[#allocation2] sm:$0x1]  ;;  %s86_s28 = sshll.u32 %s127_s0, 4  ;;  %s87_s28 = int_to_ptr.vmem [resolvable:$true] %s86_s28 }
   0xa   :  { %v66_v27 = vsub.s32 0, %v65_v24  ;;  %s102_s29 = scalar_lea.vmem %s87_s28, 16  ;;  %s106_s30 = scalar_lea.vmem %s87_s28, 32 }
   0xb   :  { %p103_p0 = scmp.ne.s32.totalorder %s87_s28, %s102_s29  ;;  %p107_p1 = scmp.lt.s32.totalorder %s87_s28, %s87_s28 }
   0xc   :  { %p108_p2 = scmp.lt.s32.totalorder %s106_s30, %s102_s29 }
   0xd   :  { %61 = vperm.xlu0 %96, %v58_v6  }
   0xe   :  { %p109_p3 = por %p108_p2, %p107_p1 }
  0x10   :  { %p110_p4 = pnand %p109_p3, %p103_p0 }
  0x84   :  { %v38_v7 = vpop.permute.xlu1 %37  ;;  %v28_v8 = vpop.permute.xlu0 %27 }
  0x85   :  { %v45_v13 = vmul.f32 %v28_v8, %v17_v9  ;;  %v47_v17 = vmul.f32 %v38_v7, %v19_v11 }
  0x88   :  { %v33_v12 = vpop.permute.xlu0 %32  ;;  %v43_v15 = vpop.permute.xlu1 %42 }
  0x89   :  { %v46_v14 = vmul.f32 %v33_v12, %v18_v10  ;;  %v48_v19 = vmul.f32 %v43_v15, %v20_v16 }
  0x8b   :  { %v49_v18 = vadd.f32 %v46_v14, %v45_v13 }
  0x8c   :  { %v62_v29 = vpop.permute.xlu0 %61 }
  0x8d   :  { %v50_v20 = vadd.f32 %v49_v18, %v47_v17  ;;  %v67_v32 = vrot.slane %v62_v29, %v66_v27 }
  0x8f   :  { %v51_v21 = vadd.f32 %v50_v20, %v48_v19 }
  0x91   :  { %v52_v23 = vrot.slane %v51_v21, 4 }
  0x93   :  { %v53_v25 = vadd.f32 %v52_v23, %v51_v21 }
  0x95   :  { %v54_v26 = vrot.slane %v53_v25, 2 }
  0x97   :  { %v55_v28 = vadd.f32 %v54_v26, %v53_v25 }
  0x99   :  { %v56_v30 = vrot.slane %v55_v28, 1 }
  0x9b   :  { %v57_v31 = vadd.f32 %v56_v30, %v55_v28 }
  0x9d   :  { %v68_v33 = vadd.f32 %v67_v32, %v57_v31 }
  0x9f   :  { %v69_v34 = vand.u32 2147483647, %v68_v33  ;;  %vm73_vm0 = vcmp.ge.f32.partialorder %v68_v33, 0.0 }
  0xa1   :  { %v70_v35 = vsub.f32 0.0, %v69_v34 }
  0xa3   :  { %v71_v36 = vmul.f32 1.442695, %v70_v35 }
  0xa5   :  { %98 = vpow2.f32 %v71_v36 }
  0xaf   :  { %v99_v37 = vpop.eup %98 }
  0xb0   :  { %v74_v38 = vadd.f32 1.0, %v99_v37 }
  0xb2   :  { %100 = vrcp.f32 %v74_v38 }
  0xbc   :  { %v101_v39 = vpop.eup %100 }
  0xbd   :  { %v77_v40 = vmul.f32 %v101_v39, %v99_v37 }
  0xbf   :  { %v78_v41 = vsel %vm73_vm0, %v101_v39, %v77_v40 }
  0xc0   :  { %79 = vst [vmem:[#allocation3] sm:$0x1] %v78_v41 }
  0xc1   :  { %113 = shalt.err (!%p110_p4)
}
  0xc2   :  { %s114_s6 = scalar_lea.hbm %s190_s3, 16 }
  0xc3   :  { %p115_p5 = scmp.ne.s32.totalorder %s190_s3, %s114_s6  ;;  %p118_p6 = scmp.lt.u32.totalorder %s114_s6, %s190_s3 }
  0xc5   :  { %p120_p7 = pnand %p118_p6, %p115_p5 }
  0xc7   :  { %123 = shalt.err (!%p120_p7)
}
  0xc8   :  { %89 = dma.vmem_to_hbm [thread:$0]  %s87_s28, 16, %s190_s3, [#allocation4]  }
  0xc9   :  { %124 = dma.done.wait [#allocation4], 16  }
  0xca   :  { %125 = vsyncadd [#allocation4], 4294967280 }
  0xcb   :  { %93 = vsyncpa [#allocation4], 1 }

</bundles_post_ra>
